<compile_context>
chip_gen: v7x
topology: tpu7x:2x2x1
jax: 0.10.0
libtpu: 0.0.40
codegen_flags: <defaults>
</compile_context>

<pallas_src>
import functools

import numpy as np
import jax
import jax.numpy as jnp
from jax import lax
from jax.experimental import pallas as pl
from jax.experimental.pallas import tpu as pltpu


def _mem_alpha_loss_kernel(mp_ref, mt_ref, ap_ref, at_ref, out_ref, *,
                           c_mem, c_alpha, c_cross, inv_n):
    """Single-block path: whole (1, n) vectors resident in VMEM."""
    f32 = jnp.float32
    d_mem = mp_ref[...].astype(f32) - mt_ref[...].astype(f32)
    d_alpha = ap_ref[...].astype(f32) - at_ref[...].astype(f32)
    # Single fused weighted accumulator -> one cross-lane reduction.
    w = (c_mem * (d_mem * d_mem)
         + c_alpha * (d_alpha * d_alpha)
         + c_cross * (d_mem * d_alpha))
    out_ref[0, 0] = jnp.sum(w) * inv_n


def _mem_alpha_loss_grid_kernel(mp_ref, mt_ref, ap_ref, at_ref, out_ref, *,
                                c_mem, c_alpha, c_cross, inv_n, n, tile_n,
                                mask_tail):
    """Gridded path: (1, tile_n) lane-dense chunks, SMEM scalar accumulator."""
    f32 = jnp.float32
    j = pl.program_id(0)

    @pl.when(j == 0)
    def _():
        out_ref[0, 0] = jnp.float32(0.0)

    d_mem = mp_ref[...].astype(f32) - mt_ref[...].astype(f32)
    d_alpha = ap_ref[...].astype(f32) - at_ref[...].astype(f32)
    w = (c_mem * (d_mem * d_mem)
         + c_alpha * (d_alpha * d_alpha)
         + c_cross * (d_mem * d_alpha))

    if mask_tail:
        # Final partial block reads unspecified lanes past n; select 0 via
        # jnp.where (not multiplication) so stale NaN/Inf cannot leak in.
        col = lax.broadcasted_iota(jnp.int32, w.shape, 1) + j * tile_n
        w = jnp.where(col < n, w, 0.0)

    out_ref[0, 0] += jnp.sum(w)

    @pl.when(j == pl.num_programs(0) - 1)
    def _():
        out_ref[0, 0] = out_ref[0, 0] * inv_n


def mem_alpha_loss(mem_pred, mem_true, alpha_pred, alpha_true, *,
                   mse_mem_coeff=1.0, mse_alpha_coeff=0.1,
                   decay_curve_coeff=0.01, npoints=100, tile_n=32768):
    """Pallas implementation of MemAlphaLoss.forward.

    mem_pred / mem_true / alpha_pred / alpha_true: shape [n] float arrays.
    Returns a scalar float32 loss.

    tile_n: lane-chunk size for the gridded path (used when n > tile_n).
            Default keeps per-block double-buffered VMEM well under the v7x
            32 MiB scoped limit; sweep per generation for very large n.
    """
    n = mem_pred.shape[0]
    if n == 0:
        # torch mse_loss over an empty batch is NaN; keep that semantics.
        return jnp.float32(float("nan"))

    f32 = jnp.float32

    # Static lag-grid moments: closed form removes the (n, npoints) tensor.
    lags = np.linspace(0.0, 180.0, npoints) - 80.0
    s1 = float(np.mean(lags))
    s2 = float(np.mean(lags * lags))

    dc = float(decay_curve_coeff)
    c_mem = float(mse_mem_coeff) + dc
    c_alpha = float(mse_alpha_coeff) + dc * s2
    c_cross = 2.0 * dc * s1
    inv_n = 1.0 / float(n)

    # (n,) -> (1, n): pure metadata reshape, no stack/pad HBM round trip.
    args = tuple(v.reshape(1, n)
                 for v in (mem_pred, mem_true, alpha_pred, alpha_true))

    tile_n = max(128, (int(tile_n) // 128) * 128)   # lane-dim multiple of 128

    if n <= tile_n:
        # Small batch: single grid-less block (no pipelining needed).
        kernel = functools.partial(
            _mem_alpha_loss_kernel,
            c_mem=c_mem, c_alpha=c_alpha, c_cross=c_cross, inv_n=inv_n)
        out = pl.pallas_call(
            kernel,
            out_shape=jax.ShapeDtypeStruct((1, 1), f32),
            in_specs=[pl.BlockSpec(memory_space=pltpu.MemorySpace.VMEM)] * 4,
            out_specs=pl.BlockSpec(memory_space=pltpu.MemorySpace.SMEM),
        )(*args)
    else:
        # Large batch: 1-D grid over lane-dense chunks, pipelined input DMA.
        num_blocks = pl.cdiv(n, tile_n)
        mask_tail = (n % tile_n) != 0
        kernel = functools.partial(
            _mem_alpha_loss_grid_kernel,
            c_mem=c_mem, c_alpha=c_alpha, c_cross=c_cross, inv_n=inv_n,
            n=n, tile_n=tile_n, mask_tail=mask_tail)
        block = pl.BlockSpec((1, tile_n), lambda j: (0, j))
        out = pl.pallas_call(
            kernel,
            out_shape=jax.ShapeDtypeStruct((1, 1), f32),
            grid=(num_blocks,),
            in_specs=[block] * 4,
            out_specs=pl.BlockSpec((1, 1), lambda j: (0, 0),
                                   memory_space=pltpu.MemorySpace.SMEM),
            compiler_params=pltpu.CompilerParams(
                dimension_semantics=("arbitrary",)),
        )(*args)

    return out[0, 0]


def _reference(mem_pred, mem_true, alpha_pred, alpha_true,
               mse_mem_coeff=1.0, mse_alpha_coeff=0.1,
               decay_curve_coeff=0.01, npoints=100):
    """Faithful JAX port of the PyTorch module (keeps the (n, npoints) tensor)."""
    f32 = jnp.float32
    mem_pred = mem_pred.astype(f32)
    mem_true = mem_true.astype(f32)
    alpha_pred = alpha_pred.astype(f32)
    alpha_true = alpha_true.astype(f32)
    mse_mem = jnp.mean((mem_pred - mem_true) ** 2)
    mse_alpha = jnp.mean((alpha_pred - alpha_true) ** 2)
    lags = jnp.asarray(np.linspace(0.0, 180.0, npoints), dtype=f32)[None, :]
    dct = alpha_true[:, None] * (lags - 80.0) + mem_true[:, None]
    dcp = alpha_pred[:, None] * (lags - 80.0) + mem_pred[:, None]
    decay_mse = jnp.mean((dcp - dct) ** 2)
    return (mse_mem_coeff * mse_mem + mse_alpha_coeff * mse_alpha
            + decay_curve_coeff * decay_mse)


if __name__ == "__main__":
    # --- Small batch: single-block fast path (the module's typical use). ---
    key = jax.random.PRNGKey(0)
    k1, k2, k3, k4 = jax.random.split(key, 4)
    n = 8
    mem_true = jax.random.uniform(k1, (n,), dtype=jnp.float32)
    mem_pred = jax.random.uniform(k2, (n,), dtype=jnp.float32)
    alpha_true = -0.01 * jax.random.uniform(k3, (n,), dtype=jnp.float32)
    alpha_pred = -0.01 * jax.random.uniform(k4, (n,), dtype=jnp.float32)

    loss = mem_alpha_loss(mem_pred, mem_true, alpha_pred, alpha_true)
    loss = jax.block_until_ready(loss)
    ref = _reference(mem_pred, mem_true, alpha_pred, alpha_true)
    assert jnp.allclose(loss, ref, rtol=1e-4, atol=1e-5), (loss, ref)

    # --- Larger batch: exercises the gridded / pipelined path, including the
    #     partial-final-block tail mask (small tile_n so the grid is >1). ---
    n2 = 1500
    k5, k6, k7, k8 = jax.random.split(jax.random.PRNGKey(1), 4)
    mem_true2 = jax.random.uniform(k5, (n2,), dtype=jnp.float32)
    mem_pred2 = jax.random.uniform(k6, (n2,), dtype=jnp.float32)
    alpha_true2 = -0.01 * jax.random.uniform(k7, (n2,), dtype=jnp.float32)
    alpha_pred2 = -0.01 * jax.random.uniform(k8, (n2,), dtype=jnp.float32)

    loss2 = mem_alpha_loss(mem_pred2, mem_true2, alpha_pred2, alpha_true2,
                           tile_n=512)
    loss2 = jax.block_until_ready(loss2)
    ref2 = _reference(mem_pred2, mem_true2, alpha_pred2, alpha_true2)
    assert jnp.allclose(loss2, ref2, rtol=1e-4, atol=1e-5), (loss2, ref2)

    print("KERNEL_OK")
</pallas_src>

<mosaic_0001>
module attributes {stable_mosaic.version = 11 : i64} {
  func.func @_mem_alpha_loss_kernel(%arg0: memref<1x8xf32, #tpu.memory_space<vmem>>, %arg1: memref<1x8xf32, #tpu.memory_space<vmem>>, %arg2: memref<1x8xf32, #tpu.memory_space<vmem>>, %arg3: memref<1x8xf32, #tpu.memory_space<vmem>>, %arg4: memref<1x1xf32, #tpu.memory_space<smem>>) attributes {dimension_semantics = [], scalar_prefetch = 0 : i64, scratch_operands = 0 : i64, tpu.core_type = #tpu.core_type<tc>} {
    %c0 = arith.constant 0 : index
    %c0_0 = arith.constant 0 : index
    %0 = vector.load %arg0[%c0, %c0_0] : memref<1x8xf32, #tpu.memory_space<vmem>>, vector<1x8xf32>
    %c0_1 = arith.constant 0 : index
    %c0_2 = arith.constant 0 : index
    %1 = vector.load %arg1[%c0_1, %c0_2] : memref<1x8xf32, #tpu.memory_space<vmem>>, vector<1x8xf32>
    %2 = arith.subf %0, %1 : vector<1x8xf32>
    %c0_3 = arith.constant 0 : index
    %c0_4 = arith.constant 0 : index
    %3 = vector.load %arg2[%c0_3, %c0_4] : memref<1x8xf32, #tpu.memory_space<vmem>>, vector<1x8xf32>
    %c0_5 = arith.constant 0 : index
    %c0_6 = arith.constant 0 : index
    %4 = vector.load %arg3[%c0_5, %c0_6] : memref<1x8xf32, #tpu.memory_space<vmem>>, vector<1x8xf32>
    %5 = arith.subf %3, %4 : vector<1x8xf32>
    %6 = arith.mulf %2, %2 : vector<1x8xf32>
    %cst = arith.constant 1.010000e+00 : f32
    %7 = vector.broadcast %cst : f32 to vector<1x8xf32>
    %8 = arith.mulf %7, %6 : vector<1x8xf32>
    %9 = arith.mulf %5, %5 : vector<1x8xf32>
    %cst_7 = arith.constant 28.6454544 : f32
    %10 = vector.broadcast %cst_7 : f32 to vector<1x8xf32>
    %11 = arith.mulf %10, %9 : vector<1x8xf32>
    %12 = arith.addf %8, %11 : vector<1x8xf32>
    %13 = arith.mulf %2, %5 : vector<1x8xf32>
    %cst_8 = arith.constant 2.000000e-01 : f32
    %14 = vector.broadcast %cst_8 : f32 to vector<1x8xf32>
    %15 = arith.mulf %14, %13 : vector<1x8xf32>
    %16 = arith.addf %12, %15 : vector<1x8xf32>
    %17 = vector.shape_cast %16 : vector<1x8xf32> to vector<1x1x8xf32>
    %cst_9 = arith.constant dense<0.000000e+00> : vector<1xf32>
    %18 = vector.multi_reduction <add>, %17, %cst_9 [1, 2] : vector<1x1x8xf32> to vector<1xf32>
    %19 = vector.shape_cast %18 : vector<1xf32> to vector<1x1x1xf32>
    %20 = vector.extract %19[0, 0, 0] : f32 from vector<1x1x1xf32>
    %cst_10 = arith.constant 1.250000e-01 : f32
    %21 = arith.mulf %20, %cst_10 : f32
    %c0_11 = arith.constant 0 : index
    %c0_12 = arith.constant 0 : index
    %22 = memref.load %arg4[%c0_11, %c0_12] : memref<1x1xf32, #tpu.memory_space<smem>>
    memref.store %21, %arg4[%c0_11, %c0_12] : memref<1x1xf32, #tpu.memory_space<smem>>
    return
  }
}

</mosaic_0001>

<bundles_post_ra>
// kernel: tpu_custom_call.1
= control target key start
LH: loop header
LB: loop body
LE: loop exit
PB: predicated region body
PF: predicated region fallthrough
CT: control target
= control target key end

     0   :  { %9 = vsyncpa [#allocation3], 0  ;;  %s172_s0 = inlined_call_operand.hbm [shape: f32[1,8], index: 0, kind: input, shape index: {}]   ;;  %s173_s1 = inlined_call_operand.vmem [shape: f32[1,8], index: 1, kind: input, shape index: {}]   ;;  %s174_s2 = inlined_call_operand.vmem [shape: f32[1,8], index: 2, kind: input, shape index: {}]   ;;  %s175_s3 = inlined_call_operand.vmem [shape: f32[1,8], index: 3, kind: input, shape index: {}]   ;;  %s176_s4 = inlined_call_operand.hbm [shape: f32[1,1], index: 4, kind: output, shape index: {}]  }
   0x1   :  { %10 = vsyncpa [#allocation4], 0  ;;  %s112_s15 = smov [#allocation2]   ;;  %s76_s19 = scalar_lea.hbm %s172_s0, 16 }
   0x2   :  { %s17_s16 = sshll.u32 %s112_s15, 4  ;;  %p77_p0 = scmp.ne.s32.totalorder %s172_s0, %s76_s19  ;;  %s18_s16 = int_to_ptr.vmem [resolvable:$true] %s17_s16 }
   0x3   :  { %p80_p1 = scmp.lt.u32.totalorder %s76_s19, %s172_s0 }
   0x5   :  { %p82_p2 = pnand %p80_p1, %p77_p0 }
   0x7   :  { %85 = shalt.err (!%p82_p2)
}
   0x8   :  { %s86_s24 = scalar_lea.vmem %s18_s16, 16  ;;  %s90_s25 = scalar_lea.vmem %s18_s16, 32 }
   0x9   :  { %p87_p3 = scmp.ne.s32.totalorder %s18_s16, %s86_s24  ;;  %p91_p4 = scmp.lt.s32.totalorder %s18_s16, %s18_s16 }
   0xa   :  { %p92_p5 = scmp.lt.s32.totalorder %s90_s25, %s86_s24 }
   0xc   :  { %p93_p6 = por %p92_p5, %p91_p4 }
   0xe   :  { %p94_p7 = pnand %p93_p6, %p87_p3 }
  0x10   :  { %97 = shalt.err (!%p94_p7)
}
  0x11   :  { %20 = dma.hbm_to_vmem [thread:$0]  %s172_s0, 16, %s18_s16, [#allocation3]  }
  0x12   :  { %108 = dma.done.wait [#allocation3], 16  }
  0x13   :  { %109 = vsyncadd [#allocation3], 4294967280  ;;  %v30_v0 = vld [vmem:[#allocation2] sm:$0x1]  ;;  %vm44_vm0 = vcmask 57344   ;;  %s98_s8 = scalar_lea.hbm %s176_s4, 16 }
  0x14   :  { %v31_v1 = vld [vmem:[%s173_s1] sm:$0x1]  ;;  %p99_p8 = scmp.ne.s32.totalorder %s176_s4, %s98_s8  ;;  %p102_p9 = scmp.lt.u32.totalorder %s98_s8, %s176_s4 }
  0x15   :  { %v33_v2 = vld [vmem:[%s174_s2] sm:$0x1]  ;;  %v32_v3 = vsub.f32 %v30_v0, %v31_v1 }
  0x16   :  { %v34_v4 = vld [vmem:[%s175_s3] sm:$0x1]  ;;  %p104_p10 = pnand %p102_p9, %p99_p8 }
  0x17   :  { %v35_v5 = vsub.f32 %v33_v2, %v34_v4  ;;  %v36_v6 = vmul.f32 %v32_v3, %v32_v3 }
  0x19   :  { %v38_v7 = vmul.f32 %v35_v5, %v35_v5  ;;  %v41_v8 = vmul.f32 %v35_v5, %v32_v3  ;;  %v37_v9 = vmul.f32 1.01, %v36_v6 }
  0x1b   :  { %v39_v10 = vmul.f32 28.645454, %v38_v7  ;;  %v42_v11 = vmul.f32 0.2, %v41_v8 }
  0x1d   :  { %v40_v12 = vadd.f32 %v39_v10, %v37_v9 }
  0x1f   :  { %v43_v13 = vadd.f32 %v42_v11, %v40_v12 }
  0x21   :  { %v45_v14 = vsel %vm44_vm0, %v43_v13, 0.0 }
  0x22   :  { %46 = vadd.xlane.f32.xlu0 %v45_v14 }
  0xaf   :  { %v47_v15 = vpop.xlane.xlu0 %46 }
  0xb0   :  { %v48_v16 = vrot.slane %v47_v15, 4 }
  0xb2   :  { %v49_v17 = vadd.f32 %v48_v16, %v47_v15 }
  0xb4   :  { %v50_v18 = vrot.slane %v49_v17, 2 }
  0xb6   :  { %v51_v19 = vadd.f32 %v50_v18, %v49_v17 }
  0xb8   :  { %v52_v20 = vrot.slane %v51_v19, 1 }
  0xba   :  { %v53_v21 = vadd.f32 %v52_v20, %v51_v19 }
  0xbc   :  { %72 = vpush %v53_v21 }
  0xed   :  { %s73_s0 = spop %72 }
  0xee   :  { %s55_s1 = smul.f32 0.125, %s73_s0 }
  0xf0   :  { %57 = sst [smem:[#allocation5]] %s55_s1 }
  0xf1   :  { %107 = shalt.err (!%p104_p10)
}
  0xf2   :  { %s113_s13 = smov [#allocation5]  }
  0xf3   :  { %65 = dma.smem_to_hbm %s113_s13, 16, %s176_s4, [#allocation4]  }
  0xf4   :  { %110 = dma.done.wait [#allocation4], 16  }
  0xf5   :  { %111 = vsyncadd [#allocation4], 4294967280 }
  0xf6   :  { %69 = sfence }
  0xf7   :  { %70 = vsyncpa [#allocation3], 1 }
  0xf8   :  { %71 = vsyncpa [#allocation4], 1 }

</bundles_post_ra>
